<compile_context>
chip_gen: v5e
topology: v5e:2x2
jax: 0.10.0
libtpu: 0.0.40
codegen_flags: <defaults>
</compile_context>

<pallas_src>
import jax
import jax.numpy as jnp
from jax.experimental import pallas as pl
from jax.experimental.pallas import tpu as pltpu

_MIB = 1024 * 1024

# Lane-dense widths tried first (all multiples of 128).  Wider lanes give
# longer unmasked vst runs; only taken if the row count keeps sublanes dense.
_LANE_CANDIDATES = (8192, 4096, 2048, 1024, 512, 256, 128)


def _tanh_kernel(x_ref, o_ref):
    # Compute in f32 (tighter match to torch.tanh for bf16/f16, promotes int
    # inputs).  The casts are VPU work and tanh runs on the EUP, so compute is
    # fully hidden under the HBM-bound DMA pipeline.
    x = x_ref[...].astype(jnp.float32)
    o_ref[...] = jnp.tanh(x).astype(o_ref.dtype)


def _round_up(n, m):
    return ((n + m - 1) // m) * m


def _num_tensorcores():
    """Best-effort TensorCores-per-device count (megacore / v7x -> 2)."""
    try:
        kind = str(getattr(jax.devices()[0], "device_kind", "")).lower()
    except Exception:
        return 1
    if not kind:
        return 1
    # Single-TC parts: v5e ("v5 lite"/"v5e") and v6e ("v6 lite"/"v6e").
    if "lite" in kind or "v5e" in kind or "v6e" in kind:
        return 1
    # v4 / v5p (megacore) / v7x, or unknown: assume 2.  Worst case on a
    # single-TC part this costs one extra ~0.35 us grid step.
    return 2


def _vmem_plan(num_tc):
    """(target_tile_bytes, vmem_limit_bytes), generation-aware.

    v5e/v6e have 128 MiB VMEM on a single TC -> bigger tiles, higher limit.
    v7x has only 64 MiB per TC -> cap the 4-buffer footprint around half of
    that so full double-buffering survives.  Unknown parts get the
    conservative plan (safe on every generation).
    """
    cap = 0
    try:
        cap = int(getattr(pltpu.get_tpu_info(), "vmem_capacity_bytes", 0))
    except Exception:
        cap = 0
    if cap >= 96 * _MIB and num_tc == 1:      # v5e / v6e: 128 MiB physical
        return 16 * _MIB, 80 * _MIB
    return 8 * _MIB, 48 * _MIB                # v7x / unknown: keep headroom


def pallas_tanh(x):
    """tanh(x) computed in a Pallas TPU kernel; matches torch.tanh for any shape."""
    x = jnp.asarray(x)
    orig_shape = x.shape
    in_dtype = x.dtype
    # torch.tanh promotes integer/bool inputs to float; floats keep their dtype.
    out_dtype = in_dtype if jnp.issubdtype(in_dtype, jnp.floating) else jnp.float32
    n = x.size

    if n == 0:
        return x.astype(out_dtype)

    itemsize = jnp.dtype(in_dtype).itemsize
    out_itemsize = jnp.dtype(out_dtype).itemsize
    # Native sublane multiple per dtype width (f32:8, bf16/f16:16, int8/fp8:32).
    sub = {4: 8, 2: 16, 1: 32}.get(itemsize, 8)

    num_tc = _num_tensorcores()
    target_tile_bytes, vmem_limit = _vmem_plan(num_tc)
    cparams = pltpu.CompilerParams(
        dimension_semantics=("parallel",),
        vmem_limit_bytes=vmem_limit,
    )

    flat = x.reshape(-1)  # row-major flatten: free (no copy)

    # ---- ragged path: element count not a multiple of 128 -------------------
    if n % 128 != 0:
        # Run the same kernel on the UNPADDED data viewed as (1, n) with
        # 128-multiple lane blocks.  The ragged last block's OOB lanes hold
        # garbage on read and are dropped on write (fine for elementwise).
        # No jnp.pad and no output slice => no extra HBM round trips.  The
        # single-sublane view wastes some VMEM density, so keep blocks modest.
        tile_lane = 128 * 1024
        if tile_lane >= n:
            tile_lane = _round_up(n, 128)  # single block covering everything
        x2d = flat.reshape(1, n)
        out2d = pl.pallas_call(
            _tanh_kernel,
            out_shape=jax.ShapeDtypeStruct((1, n), out_dtype),
            grid_spec=pltpu.PrefetchScalarGridSpec(
                num_scalar_prefetch=0,
                grid=(pl.cdiv(n, tile_lane),),
                in_specs=[pl.BlockSpec((1, tile_lane), lambda i: (0, i))],
                out_specs=pl.BlockSpec((1, tile_lane), lambda i: (0, i)),
            ),
            compiler_params=cparams,
        )(x2d)
        return out2d.reshape(orig_shape)

    # ---- main path: lane-dense 2D view (rows, lane) --------------------------
    lane = 128
    for cand in _LANE_CANDIDATES:
        if n % cand == 0 and (n // cand) >= sub:
            lane = cand  # widest lane that still keeps sublanes dense
            break
    rows = n // lane
    x2d = flat.reshape(rows, lane)

    # Tile sizing: ~target_tile_bytes per block (sized on the wider of the
    # in/out dtypes so int->f32 promotion can't blow the VMEM budget),
    # sublane-aligned row count.
    bytes_per_row = lane * max(itemsize, out_itemsize)
    tile_rows = max(sub, (target_tile_bytes // bytes_per_row) // sub * sub)
    if tile_rows >= rows:
        # Single full-array block (full-extent dims are exempt from the
        # (8,128) divisibility rule).  On single-TC parts this stays as-is.
        tile_rows = rows

    num_blocks = pl.cdiv(rows, tile_rows)
    if num_tc > 1 and num_blocks <= 8 and rows >= num_tc * sub:
        # Multi-TC (megacore / v7x): keep a small grid split into a multiple
        # of num_tc blocks of roughly equal size so no TensorCore idles.
        target_blocks = max(num_blocks, num_tc)
        if target_blocks % num_tc:
            target_blocks += num_tc - (target_blocks % num_tc)
        tile_rows = min(tile_rows, _round_up(pl.cdiv(rows, target_blocks), sub))
        num_blocks = pl.cdiv(rows, tile_rows)

    # Ragged last block (if any) is fine: OOB writes are dropped by Pallas.
    out2d = pl.pallas_call(
        _tanh_kernel,
        out_shape=jax.ShapeDtypeStruct((rows, lane), out_dtype),
        grid_spec=pltpu.PrefetchScalarGridSpec(
            num_scalar_prefetch=0,
            grid=(num_blocks,),
            in_specs=[pl.BlockSpec((tile_rows, lane), lambda i: (i, 0))],
            out_specs=pl.BlockSpec((tile_rows, lane), lambda i: (i, 0)),
        ),
        compiler_params=cparams,
    )(x2d)
    return out2d.reshape(orig_shape)


if __name__ == "__main__":
    key = jax.random.PRNGKey(0)
    k1, k2, k3 = jax.random.split(key, 3)

    # Small NCHW-like activation input, consistent with the module.
    x = jax.random.normal(k1, (2, 4, 16, 16), dtype=jnp.float32)
    y = pallas_tanh(x)
    jax.block_until_ready(y)
    assert y.shape == x.shape and y.dtype == x.dtype
    assert jnp.allclose(y, jnp.tanh(x), atol=1e-5, rtol=1e-5), "mismatch vs jnp.tanh"

    # Ragged path: element count not a multiple of 128 (no pad / no slice).
    x2 = jax.random.normal(k2, (3, 7, 5), dtype=jnp.float32)
    y2 = pallas_tanh(x2)
    jax.block_until_ready(y2)
    assert y2.shape == x2.shape and y2.dtype == x2.dtype
    assert jnp.allclose(y2, jnp.tanh(x2), atol=1e-5, rtol=1e-5), "mismatch (ragged)"

    # bf16 path (f32-internal compute inside the kernel).
    x3 = jax.random.normal(k3, (2, 8, 32), dtype=jnp.bfloat16)
    y3 = pallas_tanh(x3)
    jax.block_until_ready(y3)
    assert y3.shape == x3.shape and y3.dtype == x3.dtype
    assert jnp.allclose(y3.astype(jnp.float32),
                        jnp.tanh(x3.astype(jnp.float32)),
                        atol=2e-2, rtol=2e-2), "mismatch (bf16)"

    print("KERNEL_OK")
</pallas_src>

<mosaic_0001>
module attributes {stable_mosaic.version = 11 : i64} {
  func.func @_tanh_kernel(%arg0: i32, %arg1: memref<8x256xf32, #tpu.memory_space<vmem>>, %arg2: memref<8x256xf32, #tpu.memory_space<vmem>>) attributes {dimension_semantics = [#tpu.dimension_semantics<parallel>], iteration_bounds = array<i64: 1>, scalar_prefetch = 0 : i64, scratch_operands = 0 : i64, tpu.core_type = #tpu.core_type<tc>, window_params = [{transform_indices = @transform_0, window_bounds = array<i64: 8, 256>}, {transform_indices = @transform_1, window_bounds = array<i64: 8, 256>}]} {
    %c0 = arith.constant 0 : index
    %c0_0 = arith.constant 0 : index
    %0 = vector.load %arg1[%c0, %c0_0] : memref<8x256xf32, #tpu.memory_space<vmem>>, vector<8x256xf32>
    %1 = math.tanh %0 : vector<8x256xf32>
    %c0_1 = arith.constant 0 : index
    %c0_2 = arith.constant 0 : index
    %2 = vector.load %arg2[%c0_1, %c0_2] : memref<8x256xf32, #tpu.memory_space<vmem>>, vector<8x256xf32>
    tpu.vector_store %arg2[%c0_1, %c0_2], %1 {strides = array<i32>} : memref<8x256xf32, #tpu.memory_space<vmem>>, vector<8x256xf32>,
    return
  }
  func.func @transform_0(%arg0: i32) -> (i32, i32) {
    %c0_i32 = arith.constant 0 : i32
    %c0_i32_0 = arith.constant 0 : i32
    return %arg0, %c0_i32 : i32, i32
  }
  func.func @transform_1(%arg0: i32) -> (i32, i32) {
    %c0_i32 = arith.constant 0 : i32
    %c0_i32_0 = arith.constant 0 : i32
    return %arg0, %c0_i32 : i32, i32
  }
}

</mosaic_0001>

<bundles_post_ra>
// kernel: tpu_custom_call.1
= control target key start
LH: loop header
LB: loop body
LE: loop exit
PB: predicated region body
PF: predicated region fallthrough
CT: control target
= control target key end

     0   :  { %6 = vsyncpa [#allocation3], 0  ;;  %s122_s0 = inlined_call_operand.hbm [shape: f32[8,256], index: 0, kind: input, shape index: {}]   ;;  %s123_s1 = inlined_call_operand.hbm [shape: f32[8,256], index: 1, kind: output, shape index: {}]  }
   0x1   :  { %7 = vsyncpa [#allocation4], 0  ;;  %s13_s8 = sshll.u32 %s122_s0, 4  ;;  %s104_s9 = smov [#allocation2]   ;;  %s14_s8 = int_to_ptr.hbm [resolvable:$true] %s13_s8 }
   0x2   :  { %s15_s10 = sshll.u32 %s104_s9, 4  ;;  %s16_s10 = int_to_ptr.vmem [resolvable:$true] %s15_s10 }
   0x3   :  { %18 = dma.hbm_to_vmem [thread:$0]  %s14_s8, 256, %s16_s10, [#allocation3]  }
   0x4   :  { %100 = dma.done.wait [#allocation3], 256  }
   0x5   :  { %101 = vsyncadd [#allocation3], 4294967040  ;;  %v23_v0 = vld [vmem:[#allocation2] sm:$0xff]  ;;  %v24_v1 = vld [vmem:[#allocation2 + $0x8] sm:$0xff]  ;;  %s105_s11 = smov [#allocation5]   ;;  %s36_s15 = sshll.u32 %s123_s1, 4  ;;  %s37_s15 = int_to_ptr.hbm [resolvable:$true] %s36_s15 }
   0x6   :  { %48 = vtanh.f32 %v23_v0  ;;  %s34_s12 = sshll.u32 %s105_s11, 4  ;;  %s35_s12 = int_to_ptr.vmem [resolvable:$true] %s34_s12 }
   0x7   :  { %50 = vtanh.f32 %v24_v1 }
   0xc   :  { %v49_v2 = vpop.eup %48 }
   0xd   :  { %v51_v3 = vpop.eup %50  ;;  %27 = vst [vmem:[#allocation5] sm:$0xff] %v49_v2 }
   0xe   :  { %28 = vst [vmem:[#allocation5 + $0x8] sm:$0xff] %v51_v3 }
   0xf   :  { %39 = dma.vmem_to_hbm [thread:$0]  %s35_s12, 256, %s37_s15, [#allocation4]  }
  0x10   :  { %102 = dma.done.wait [#allocation4], 256  }
  0x11   :  { %103 = vsyncadd [#allocation4], 4294967040 }
  0x12   :  { %44 = vsyncpa [#allocation3], 1 }
  0x13   :  { %45 = vsyncpa [#allocation4], 1 }

</bundles_post_ra>
